<compile_context>
chip_gen: v5e
topology: v5e:2x2
jax: 0.10.0
libtpu: 0.0.40
codegen_flags: <defaults>
</compile_context>

<pallas_src>
import jax
import jax.numpy as jnp
from jax.experimental import pallas as pl
from jax.experimental.pallas import tpu as pltpu


NEG_SLOPE = 0.01   # torch.nn.LeakyReLU default negative_slope


def _leaky_relu(x):
    # single VPU max instead of compare+select (slope < 1 so this equals leaky_relu)
    return jnp.maximum(x, NEG_SLOPE * x)


def _round_up(a, m):
    return (a + m - 1) // m * m


def _top_kernel(x_ref, w1_ref, b1_ref, w2_ref, b2_ref, w3_ref, b3_ref, o_ref):
    # Transposed layout: batch on the lane axis.
    #   x_ref : (in_size, tm) bf16      w1_ref: (h1, in_size) bf16   b1_ref: (h1, 1) f32
    #   w2_ref: (h2, h1)      bf16      b2_ref: (h2, 1) f32
    #   w3_ref: (n_out, h2)   bf16      b3_ref: (n_out, 1) f32
    #   o_ref : (n_out, tm)   f32
    # fc1: single MXU pass over the full concatenated feature dim (K = in_size)
    h = jnp.dot(w1_ref[...], x_ref[...], preferred_element_type=jnp.float32)
    h = _leaky_relu(h + b1_ref[...])

    # fc2
    h = jnp.dot(w2_ref[...], h.astype(w2_ref.dtype), preferred_element_type=jnp.float32)
    h = _leaky_relu(h + b2_ref[...])

    # fc3 (output stays (n_out, tm): lane-dense along the batch, no 128-lane padding)
    h = jnp.dot(w3_ref[...], h.astype(w3_ref.dtype), preferred_element_type=jnp.float32)
    h = _leaky_relu(h + b3_ref[...])

    # Dropout(0.1) in eval mode == identity
    o_ref[...] = h.astype(o_ref.dtype)


def top_model_forward(x_list, params, *, tile_m=2048):
    """x_list: list of (B, d_i) f32 arrays (local-model outputs).
    Returns (B, n_out) f32, matching TopModel.forward in eval mode."""
    w1, b1, w2, b2, w3, b3 = params
    B = int(x_list[0].shape[0])
    in_size = sum(int(x.shape[1]) for x in x_list)
    h1 = int(w1.shape[1])
    h2 = int(w2.shape[1])
    n_out = int(w3.shape[1])

    # --- batch (lane axis) padding / tiling ---
    b_pad0 = _round_up(max(B, 1), 128)          # lane-dense minimum
    tile_m = _round_up(max(int(tile_m), 128), 128)
    if b_pad0 <= tile_m:
        if b_pad0 >= 256:
            # >= 2 grid steps so the "parallel" axis can split across v7x's 2 TensorCores
            tm = _round_up(b_pad0 // 2, 128)
        else:
            tm = b_pad0
    else:
        tm = tile_m
    b_pad = _round_up(b_pad0, tm)
    grid_m = b_pad // tm

    # --- x: torch.cat equivalent + transpose to (in_size, b_pad); bf16 MXU operand ---
    x_t = jnp.concatenate(x_list, axis=1).astype(jnp.bfloat16).T       # (in_size, B)
    x_t = jnp.pad(x_t, ((0, 0), (0, b_pad - B)))                       # (in_size, b_pad)

    # --- params: transposed, bf16 weights, f32 column biases ---
    w1_t = w1.T.astype(jnp.bfloat16)          # (h1, in_size)
    w2_t = w2.T.astype(jnp.bfloat16)          # (h2, h1)
    w3_t = w3.T.astype(jnp.bfloat16)          # (n_out, h2)
    b1_t = b1.astype(jnp.float32).T           # (h1, 1)
    b2_t = b2.astype(jnp.float32).T           # (h2, 1)
    b3_t = b3.astype(jnp.float32).T           # (n_out, 1)

    # --- specs: stream x/out tiles over the batch (lane) grid, pin weights in VMEM ---
    in_specs = [
        pl.BlockSpec((in_size, tm), lambda i: (0, i)),   # x
        pl.BlockSpec((h1, in_size), lambda i: (0, 0)),   # w1^T
        pl.BlockSpec((h1, 1),       lambda i: (0, 0)),   # b1
        pl.BlockSpec((h2, h1),      lambda i: (0, 0)),   # w2^T
        pl.BlockSpec((h2, 1),       lambda i: (0, 0)),   # b2
        pl.BlockSpec((n_out, h2),   lambda i: (0, 0)),   # w3^T
        pl.BlockSpec((n_out, 1),    lambda i: (0, 0)),   # b3
    ]
    out_spec = pl.BlockSpec((n_out, tm), lambda i: (0, i))

    flops = 2 * b_pad * (in_size * h1 + h1 * h2 + h2 * n_out)
    bytes_accessed = (
        in_size * b_pad * 2                                   # x (bf16)
        + (h1 * in_size + h2 * h1 + n_out * h2) * 2           # weights (bf16)
        + (h1 + h2 + n_out) * 4                               # biases (f32)
        + n_out * b_pad * 4                                    # output (f32)
    )

    out = pl.pallas_call(
        _top_kernel,
        out_shape=jax.ShapeDtypeStruct((n_out, b_pad), jnp.float32),
        grid=(grid_m,),
        in_specs=in_specs,
        out_specs=out_spec,
        compiler_params=pltpu.CompilerParams(
            dimension_semantics=("parallel",),
            vmem_limit_bytes=32 * 1024 * 1024,
        ),
        cost_estimate=pl.CostEstimate(
            flops=flops, transcendentals=0, bytes_accessed=bytes_accessed),
    )(x_t, w1_t, b1_t, w2_t, b2_t, w3_t, b3_t)

    # slice off batch padding, back to the torch-style (B, n_out) layout
    return out[:, :B].T


def init_params(key, in_size, h1=128, h2=256, n_out=2):
    """Deterministic init mimicking torch.nn.Linear (uniform +/- 1/sqrt(fan_in)).
    Weights are stored as (in_features, out_features); biases as (1, out_features)."""
    ks = jax.random.split(key, 6)

    def lin(kw, kb, fan_in, fan_out):
        bound = 1.0 / jnp.sqrt(jnp.float32(fan_in))
        w = jax.random.uniform(kw, (fan_in, fan_out), jnp.float32, -bound, bound)
        b = jax.random.uniform(kb, (1, fan_out), jnp.float32, -bound, bound)
        return w, b

    w1, b1 = lin(ks[0], ks[1], in_size, h1)
    w2, b2 = lin(ks[2], ks[3], h1, h2)
    w3, b3 = lin(ks[4], ks[5], h2, n_out)
    return (w1, b1, w2, b2, w3, b3)


if __name__ == "__main__":
    key = jax.random.PRNGKey(0)
    k_x1, k_x2, k_p = jax.random.split(key, 3)

    # Synthetic "local model" outputs: 2 local models, each local_out_dim=16 -> in_size=32.
    B = 2
    local_dims = (16, 16)
    x_list = [
        jax.random.normal(k_x1, (B, local_dims[0]), jnp.float32),
        jax.random.normal(k_x2, (B, local_dims[1]), jnp.float32),
    ]
    in_size = sum(local_dims)
    params = init_params(k_p, in_size)

    out = top_model_forward(x_list, params)
    out = jax.block_until_ready(out)

    # Sanity check vs a pure-JAX reference that mirrors the kernel's bf16-operand /
    # f32-accumulate math (eval-mode dropout == identity).
    def ref(xl, p):
        w1, b1, w2, b2, w3, b3 = p
        x = jnp.concatenate(xl, axis=1).astype(jnp.bfloat16)
        h = jnp.dot(x, w1.astype(jnp.bfloat16), preferred_element_type=jnp.float32) + b1
        h = jnp.maximum(h, NEG_SLOPE * h)
        h = jnp.dot(h.astype(jnp.bfloat16), w2.astype(jnp.bfloat16),
                    preferred_element_type=jnp.float32) + b2
        h = jnp.maximum(h, NEG_SLOPE * h)
        h = jnp.dot(h.astype(jnp.bfloat16), w3.astype(jnp.bfloat16),
                    preferred_element_type=jnp.float32) + b3
        h = jnp.maximum(h, NEG_SLOPE * h)
        return h

    expected = ref(x_list, params)
    assert out.shape == (B, 2), out.shape
    assert jnp.allclose(out, expected, atol=2e-2, rtol=2e-2), "mismatch vs reference"

    print("KERNEL_OK")
</pallas_src>

<mosaic_0001>
module attributes {stable_mosaic.version = 11 : i64} {
  func.func @_top_kernel(%arg0: i32, %arg1: memref<32x128xbf16, #tpu.memory_space<vmem>>, %arg2: memref<128x32xbf16, #tpu.memory_space<vmem>>, %arg3: memref<128x1xf32, #tpu.memory_space<vmem>>, %arg4: memref<256x128xbf16, #tpu.memory_space<vmem>>, %arg5: memref<256x1xf32, #tpu.memory_space<vmem>>, %arg6: memref<2x256xbf16, #tpu.memory_space<vmem>>, %arg7: memref<2x1xf32, #tpu.memory_space<vmem>>, %arg8: memref<2x128xf32, #tpu.memory_space<vmem>>) attributes {dimension_semantics = [#tpu.dimension_semantics<parallel>], iteration_bounds = array<i64: 1>, scalar_prefetch = 0 : i64, scratch_operands = 0 : i64, tpu.core_type = #tpu.core_type<tc>, window_params = [{transform_indices = @transform_0, window_bounds = array<i64: 32, 128>}, {pipeline_mode = #tpu.pipeline_mode<synchronous>, transform_indices = @transform_1, window_bounds = array<i64: 128, 32>}, {pipeline_mode = #tpu.pipeline_mode<synchronous>, transform_indices = @transform_2, window_bounds = array<i64: 128, 1>}, {pipeline_mode = #tpu.pipeline_mode<synchronous>, transform_indices = @transform_3, window_bounds = array<i64: 256, 128>}, {pipeline_mode = #tpu.pipeline_mode<synchronous>, transform_indices = @transform_4, window_bounds = array<i64: 256, 1>}, {pipeline_mode = #tpu.pipeline_mode<synchronous>, transform_indices = @transform_5, window_bounds = array<i64: 2, 256>}, {pipeline_mode = #tpu.pipeline_mode<synchronous>, transform_indices = @transform_6, window_bounds = array<i64: 2, 1>}, {transform_indices = @transform_7, window_bounds = array<i64: 2, 128>}]} {
    %c0 = arith.constant 0 : index
    %c0_0 = arith.constant 0 : index
    %0 = vector.load %arg2[%c0, %c0_0] : memref<128x32xbf16, #tpu.memory_space<vmem>>, vector<128x32xbf16>
    %c0_1 = arith.constant 0 : index
    %c0_2 = arith.constant 0 : index
    %1 = vector.load %arg1[%c0_1, %c0_2] : memref<32x128xbf16, #tpu.memory_space<vmem>>, vector<32x128xbf16>
    %cst = arith.constant dense<0.000000e+00> : vector<128x128xf32>
    %2 = tpu.matmul %0, %1, %cst {dimension_numbers = #tpu.dot_dimension_numbers<[1], [0], [0], [1], [0, 0, 1, 1], [], []>} : vector<128x32xbf16>, vector<32x128xbf16>, vector<128x128xf32> -> vector<128x128xf32>
    %c0_3 = arith.constant 0 : index
    %c0_4 = arith.constant 0 : index
    %3 = vector.load %arg3[%c0_3, %c0_4] : memref<128x1xf32, #tpu.memory_space<vmem>>, vector<128x1xf32>
    %4 = vector.broadcast %3 : vector<128x1xf32> to vector<128x128xf32>
    %5 = arith.addf %2, %4 : vector<128x128xf32>
    %cst_5 = arith.constant 0.00999999977 : f32
    %6 = vector.broadcast %cst_5 : f32 to vector<128x128xf32>
    %7 = arith.mulf %6, %5 : vector<128x128xf32>
    %8 = arith.maximumf %5, %7 : vector<128x128xf32>
    %c0_6 = arith.constant 0 : index
    %c0_7 = arith.constant 0 : index
    %9 = vector.load %arg4[%c0_6, %c0_7] : memref<256x128xbf16, #tpu.memory_space<vmem>>, vector<256x128xbf16>
    %10 = arith.truncf %8 : vector<128x128xf32> to vector<128x128xbf16>
    %cst_8 = arith.constant dense<0.000000e+00> : vector<256x128xf32>
    %11 = tpu.matmul %9, %10, %cst_8 {dimension_numbers = #tpu.dot_dimension_numbers<[1], [0], [0], [1], [0, 0, 1, 1], [], []>} : vector<256x128xbf16>, vector<128x128xbf16>, vector<256x128xf32> -> vector<256x128xf32>
    %c0_9 = arith.constant 0 : index
    %c0_10 = arith.constant 0 : index
    %12 = vector.load %arg5[%c0_9, %c0_10] : memref<256x1xf32, #tpu.memory_space<vmem>>, vector<256x1xf32>
    %13 = vector.broadcast %12 : vector<256x1xf32> to vector<256x128xf32>
    %14 = arith.addf %11, %13 : vector<256x128xf32>
    %cst_11 = arith.constant 0.00999999977 : f32
    %15 = vector.broadcast %cst_11 : f32 to vector<256x128xf32>
    %16 = arith.mulf %15, %14 : vector<256x128xf32>
    %17 = arith.maximumf %14, %16 : vector<256x128xf32>
    %c0_12 = arith.constant 0 : index
    %c0_13 = arith.constant 0 : index
    %18 = vector.load %arg6[%c0_12, %c0_13] : memref<2x256xbf16, #tpu.memory_space<vmem>>, vector<2x256xbf16>
    %19 = arith.truncf %17 : vector<256x128xf32> to vector<256x128xbf16>
    %cst_14 = arith.constant dense<0.000000e+00> : vector<2x128xf32>
    %20 = tpu.matmul %18, %19, %cst_14 {dimension_numbers = #tpu.dot_dimension_numbers<[1], [0], [0], [1], [0, 0, 1, 1], [], []>} : vector<2x256xbf16>, vector<256x128xbf16>, vector<2x128xf32> -> vector<2x128xf32>
    %c0_15 = arith.constant 0 : index
    %c0_16 = arith.constant 0 : index
    %21 = vector.load %arg7[%c0_15, %c0_16] : memref<2x1xf32, #tpu.memory_space<vmem>>, vector<2x1xf32>
    %22 = vector.broadcast %21 : vector<2x1xf32> to vector<2x128xf32>
    %23 = arith.addf %20, %22 : vector<2x128xf32>
    %cst_17 = arith.constant 0.00999999977 : f32
    %24 = vector.broadcast %cst_17 : f32 to vector<2x128xf32>
    %25 = arith.mulf %24, %23 : vector<2x128xf32>
    %26 = arith.maximumf %23, %25 : vector<2x128xf32>
    %c0_18 = arith.constant 0 : index
    %c0_19 = arith.constant 0 : index
    %27 = vector.load %arg8[%c0_18, %c0_19] : memref<2x128xf32, #tpu.memory_space<vmem>>, vector<2x128xf32>
    tpu.vector_store %arg8[%c0_18, %c0_19], %26 {strides = array<i32>} : memref<2x128xf32, #tpu.memory_space<vmem>>, vector<2x128xf32>,
    return
  }
  func.func @transform_0(%arg0: i32) -> (i32, i32) {
    %c0_i32 = arith.constant 0 : i32
    %c0_i32_0 = arith.constant 0 : i32
    return %c0_i32, %arg0 : i32, i32
  }
  func.func @transform_1(%arg0: i32) -> (i32, i32) {
    %c0_i32 = arith.constant 0 : i32
    %c0_i32_0 = arith.constant 0 : i32
    %c0_i32_1 = arith.constant 0 : i32
    return %c0_i32, %c0_i32_0 : i32, i32
  }
  func.func @transform_2(%arg0: i32) -> (i32, i32) {
    %c0_i32 = arith.constant 0 : i32
    %c0_i32_0 = arith.constant 0 : i32
    %c0_i32_1 = arith.constant 0 : i32
    return %c0_i32, %c0_i32_0 : i32, i32
  }
  func.func @transform_3(%arg0: i32) -> (i32, i32) {
    %c0_i32 = arith.constant 0 : i32
    %c0_i32_0 = arith.constant 0 : i32
    %c0_i32_1 = arith.constant 0 : i32
    return %c0_i32, %c0_i32_0 : i32, i32
  }
  func.func @transform_4(%arg0: i32) -> (i32, i32) {
    %c0_i32 = arith.constant 0 : i32
    %c0_i32_0 = arith.constant 0 : i32
    %c0_i32_1 = arith.constant 0 : i32
    return %c0_i32, %c0_i32_0 : i32, i32
  }
  func.func @transform_5(%arg0: i32) -> (i32, i32) {
    %c0_i32 = arith.constant 0 : i32
    %c0_i32_0 = arith.constant 0 : i32
    %c0_i32_1 = arith.constant 0 : i32
    return %c0_i32, %c0_i32_0 : i32, i32
  }
  func.func @transform_6(%arg0: i32) -> (i32, i32) {
    %c0_i32 = arith.constant 0 : i32
    %c0_i32_0 = arith.constant 0 : i32
    %c0_i32_1 = arith.constant 0 : i32
    return %c0_i32, %c0_i32_0 : i32, i32
  }
  func.func @transform_7(%arg0: i32) -> (i32, i32) {
    %c0_i32 = arith.constant 0 : i32
    %c0_i32_0 = arith.constant 0 : i32
    return %c0_i32, %arg0 : i32, i32
  }
}

</mosaic_0001>

<bundles_post_ra>
// kernel: tpu_custom_call.1
= control target key start
LH: loop header
LB: loop body
LE: loop exit
PB: predicated region body
PF: predicated region fallthrough
CT: control target
= control target key end

     0   :  { %v1042_v2 = vmov 0   ;;  %vm196_vm0 = vcmask 261120   ;;  %s1441_s0 = inlined_call_operand.vmem [shape: bf16[32,128], index: 0, kind: input, shape index: {}]   ;;  %s1442_s1 = inlined_call_operand.vmem [shape: bf16[128,32], index: 1, kind: input, shape index: {}]   ;;  %s1443_s2 = inlined_call_operand.vmem [shape: f32[128,1], index: 2, kind: input, shape index: {}]   ;;  %s1444_s3 = inlined_call_operand.vmem [shape: bf16[256,128], index: 3, kind: input, shape index: {}]   ;;  %s1445_s4 = inlined_call_operand.vmem [shape: f32[256,1], index: 4, kind: input, shape index: {}]   ;;  %s1446_s5 = inlined_call_operand.vmem [shape: bf16[2,256], index: 5, kind: input, shape index: {}]   ;;  %s1447_s6 = inlined_call_operand.vmem [shape: f32[2,1], index: 6, kind: input, shape index: {}]   ;;  %s1448_s7 = inlined_call_operand.hbm [shape: f32[2,128], index: 7, kind: output, shape index: {}]  }
   0x1   :  { %v62_v0 = vld [vmem:[%s1443_s2 + $0x70] sm:$0xff]  ;;  %v978_v1 = vld [vmem:[%s1441_s0 + $0x8] sm:$0xff]  ;;  %1013 = vset.pattern.permute.xlu0 %v1042_v2  ;;  %1015 = vset.pattern.permute.xlu2 %v1042_v2  ;;  %v60_v3 = vld [vmem:[%s1443_s2 + $0x60] sm:$0xff] }
   0x2   :  { %136 = vperm.xlu0 %1013, %v62_v0   ;;  %227 = vmatpush.bf16.msra.mxu0 %v978_v1  ;;  %v977_v4 = vld [vmem:[%s1441_s0] sm:$0xff]  ;;  %v58_v5 = vld [vmem:[%s1443_s2 + $0x50] sm:$0xff] }
   0x3   :  { %1014 = vset.pattern.permute.xlu1 %v1042_v2  ;;  %116 = vperm.xlu2 %1015, %v58_v5   ;;  %v969_v6 = vld [vmem:[%s1442_s1] sm:$0xff] }
   0x4   :  { %126 = vperm.xlu1 %1014, %v60_v3  }
   0x6   :  { %228 = vmatpush.bf16.msra.mxu0 %v977_v4 }
   0x7   :  { %12 = vsyncpa [#allocation3], 0  ;;  %v63_v7 = vld [vmem:[%s1443_s2 + $0x78] sm:$0xff]  ;;  %v61_v9 = vld [vmem:[%s1443_s2 + $0x68] sm:$0xff]  ;;  %s848_s24 = sshll.u32 %s1448_s7, 4  ;;  %s849_s24 = int_to_ptr.hbm [resolvable:$true] %s848_s24 }
   0x8   :  { %v59_v8 = vld [vmem:[%s1443_s2 + $0x58] sm:$0xff]  ;;  %v56_v10 = vld [vmem:[%s1443_s2 + $0x40] sm:$0xff]  ;;  %v54_v11 = vld [vmem:[%s1443_s2 + $0x30] sm:$0xff] }
   0x9   :  { %897 = vmatmul.msk.bf16.vlgmr.msra.gmra.mxu0 %vm196_vm0, %v969_v6  ;;  %v57_v12 = vld [vmem:[%s1443_s2 + $0x48] sm:$0xff]  ;;  %v55_v14 = vld [vmem:[%s1443_s2 + $0x38] sm:$0xff]  ;;  %v52_v16 = vld [vmem:[%s1443_s2 + $0x20] sm:$0xff] }
   0xa   :  { %141 = vperm.xlu0 %1013, %v63_v7   ;;  %v970_v13 = vld [vmem:[%s1442_s1 + $0x8] sm:$0xff]  ;;  %v50_v17 = vld [vmem:[%s1443_s2 + $0x10] sm:$0xff]  ;;  %v48_v18 = vld [vmem:[%s1443_s2] sm:$0xff] }
   0xb   :  { %121 = vperm.xlu2 %1015, %v59_v8   ;;  %v53_v15 = vld [vmem:[%s1443_s2 + $0x28] sm:$0xff]  ;;  %v51_v19 = vld [vmem:[%s1443_s2 + $0x18] sm:$0xff]  ;;  %v971_v20 = vld [vmem:[%s1442_s1 + $0x10] sm:$0xff] }
   0xc   :  { %131 = vperm.xlu1 %1014, %v61_v9   ;;  %v49_v21 = vld [vmem:[%s1443_s2 + $0x8] sm:$0xff]  ;;  %v356_v22 = vld [vmem:[%s1445_s4 + $0x70] sm:$0xff]  ;;  %v357_v23 = vld [vmem:[%s1445_s4 + $0x78] sm:$0xff] }
   0xd   :  { %v372_v24 = vld [vmem:[%s1445_s4 + $0xf0] sm:$0xff]  ;;  %v373_v25 = vld [vmem:[%s1445_s4 + $0xf8] sm:$0xff]  ;;  %v354_v26 = vld [vmem:[%s1445_s4 + $0x60] sm:$0xff] }
   0xe   :  { %v972_v27 = vld [vmem:[%s1442_s1 + $0x18] sm:$0xff]  ;;  %v355_v28 = vld [vmem:[%s1445_s4 + $0x68] sm:$0xff]  ;;  %v370_v29 = vld [vmem:[%s1445_s4 + $0xe0] sm:$0xff] }
   0xf   :  { %v371_v30 = vld [vmem:[%s1445_s4 + $0xe8] sm:$0xff]  ;;  %v352_v31 = vld [vmem:[%s1445_s4 + $0x50] sm:$0xff]  ;;  %v353_v32 = vld [vmem:[%s1445_s4 + $0x58] sm:$0xff] }
  0x10   :  { %v368_v33 = vld [vmem:[%s1445_s4 + $0xd0] sm:$0xff]  ;;  %v973_v34 = vld [vmem:[%s1442_s1 + $0x20] sm:$0xff]  ;;  %v369_v35 = vld [vmem:[%s1445_s4 + $0xd8] sm:$0xff] }
  0x11   :  { %v350_v36 = vld [vmem:[%s1445_s4 + $0x40] sm:$0xff]  ;;  %v351_v37 = vld [vmem:[%s1445_s4 + $0x48] sm:$0xff]  ;;  %v348_v40 = vld [vmem:[%s1445_s4 + $0x30] sm:$0xff] }
  0x12   :  { %106 = vperm.xlu0 %1013, %v56_v10   ;;  %v366_v38 = vld [vmem:[%s1445_s4 + $0xc0] sm:$0xff]  ;;  %v367_v39 = vld [vmem:[%s1445_s4 + $0xc8] sm:$0xff]  ;;  %v349_v42 = vld [vmem:[%s1445_s4 + $0x38] sm:$0xff] }
  0x13   :  { %96 = vperm.xlu2 %1015, %v54_v11   ;;  %v974_v41 = vld [vmem:[%s1442_s1 + $0x28] sm:$0xff]  ;;  %v364_v43 = vld [vmem:[%s1445_s4 + $0xb0] sm:$0xff]  ;;  %v365_v44 = vld [vmem:[%s1445_s4 + $0xb8] sm:$0xff] }
  0x14   :  { %111 = vperm.xlu1 %1014, %v57_v12   ;;  %v346_v45 = vld [vmem:[%s1445_s4 + $0x20] sm:$0xff]  ;;  %v347_v46 = vld [vmem:[%s1445_s4 + $0x28] sm:$0xff]  ;;  %v975_v47 = vld [vmem:[%s1442_s1 + $0x30] sm:$0xff] }
  0x15   :  { %v363_v48 = vld [vmem:[%s1445_s4 + $0xa8] sm:$0xff]  ;;  %v362_v49 = vld [vmem:[%s1445_s4 + $0xa0] sm:$0xff]  ;;  %v344_v50 = vld [vmem:[%s1445_s4 + $0x10] sm:$0xff] }
  0x16   :  { %v345_v52 = vld [vmem:[%s1445_s4 + $0x18] sm:$0xff]  ;;  %v360_v53 = vld [vmem:[%s1445_s4 + $0x90] sm:$0xff]  ;;  %v343_v58 = vld [vmem:[%s1445_s4 + $0x8] sm:$0xff] }
  0x17   :  { %v361_v54 = vld [vmem:[%s1445_s4 + $0x98] sm:$0xff]  ;;  %v342_v59 = vld [vmem:[%s1445_s4] sm:$0xff]  ;;  %v359_v1 = vld [vmem:[%s1445_s4 + $0x88] sm:$0xff] }
  0x18   :  { %v976_v56 = vld [vmem:[%s1442_s1 + $0x38] sm:$0xff]  ;;  %v358_v61 = vld [vmem:[%s1445_s4 + $0x80] sm:$0xff] }
  0x19   :  { %898 = vmatmul.msk.bf16.gmra.mxu0 %vm196_vm0, %v970_v13  ;;  %v800_v0 = vld [vmem:[%s1447_s6] sm:$0x3] }
  0x1a   :  { %101 = vperm.xlu0 %1013, %v55_v14  }
  0x1b   :  { %91 = vperm.xlu2 %1015, %v53_v15  }
  0x1c   :  { %86 = vperm.xlu1 %1014, %v52_v16  }
  0x22   :  { %76 = vperm.xlu0 %1013, %v50_v17  }
  0x23   :  { %66 = vperm.xlu2 %1015, %v48_v18  }
  0x24   :  { %81 = vperm.xlu1 %1014, %v51_v19  }
  0x29   :  { %899 = vmatmul.msk.bf16.gmra.mxu0 %vm196_vm0, %v971_v20 }
  0x2a   :  { %71 = vperm.xlu0 %1013, %v49_v21  }
  0x2b   :  { %451 = vperm.xlu2 %1015, %v357_v23  }
  0x2c   :  { %446 = vperm.xlu1 %1014, %v356_v22  }
  0x32   :  { %526 = vperm.xlu0 %1013, %v372_v24  }
  0x33   :  { %436 = vperm.xlu2 %1015, %v354_v26  }
  0x34   :  { %531 = vperm.xlu1 %1014, %v373_v25  }
  0x39   :  { %900 = vmatmul.msk.bf16.gmra.mxu0 %vm196_vm0, %v972_v27 }
  0x3a   :  { %441 = vperm.xlu0 %1013, %v355_v28  }
  0x3b   :  { %521 = vperm.xlu2 %1015, %v371_v30  }
  0x3c   :  { %516 = vperm.xlu1 %1014, %v370_v29  }
  0x42   :  { %426 = vperm.xlu0 %1013, %v352_v31  }
  0x43   :  { %506 = vperm.xlu2 %1015, %v368_v33  }
  0x44   :  { %431 = vperm.xlu1 %1014, %v353_v32  }
  0x49   :  { %901 = vmatmul.msk.bf16.gmra.mxu0 %vm196_vm0, %v973_v34 }
  0x4a   :  { %511 = vperm.xlu0 %1013, %v369_v35  }
  0x4b   :  { %421 = vperm.xlu2 %1015, %v351_v37  }
  0x4c   :  { %416 = vperm.xlu1 %1014, %v350_v36  }
  0x52   :  { %496 = vperm.xlu0 %1013, %v366_v38  }
  0x53   :  { %406 = vperm.xlu2 %1015, %v348_v40  }
  0x54   :  { %501 = vperm.xlu1 %1014, %v367_v39  }
  0x59   :  { %902 = vmatmul.msk.bf16.gmra.mxu0 %vm196_vm0, %v974_v41 }
  0x5a   :  { %411 = vperm.xlu0 %1013, %v349_v42  }
  0x5b   :  { %491 = vperm.xlu2 %1015, %v365_v44  }
  0x5c   :  { %486 = vperm.xlu1 %1014, %v364_v43  }
  0x5d   :  { %v1241_v51 = vpop.permute.xlu2 %116 }
  0x62   :  { %396 = vperm.xlu0 %1013, %v346_v45  }
  0x63   :  { %476 = vperm.xlu2 %1015, %v362_v49  }
  0x64   :  { %401 = vperm.xlu1 %1014, %v347_v46  }
  0x65   :  { %v1265_v60 = vpop.permute.xlu2 %121 }
  0x69   :  { %903 = vmatmul.msk.bf16.gmra.mxu0 %vm196_vm0, %v975_v47 }
  0x6a   :  { %481 = vperm.xlu0 %1013, %v363_v48  }
  0x6b   :  { %391 = vperm.xlu2 %1015, %v345_v52  }
  0x6c   :  { %386 = vperm.xlu1 %1014, %v344_v50  }
  0x6d   :  { %v97_v2 = vpop.permute.xlu2 %96 }
  0x72   :  { %466 = vperm.xlu0 %1013, %v360_v53  }
  0x73   :  { %376 = vperm.xlu2 %1015, %v342_v59  }
  0x74   :  { %v1252_v55 = vpop.permute.xlu0 %136  ;;  %471 = vperm.xlu1 %1014, %v361_v54  }
  0x75   :  { %v92_v6 = vpop.permute.xlu2 %91 }
  0x76   :  { %v1257_v57 = vpop.permute.xlu1 %126 }
  0x79   :  { %904 = vmatmul.msk.bf16.gmra.mxu0 %vm196_vm0, %v976_v56 }
  0x7a   :  { %381 = vperm.xlu0 %1013, %v343_v58  }
  0x7b   :  { %461 = vperm.xlu2 %1015, %v359_v1  }
  0x7c   :  { %v1271_v62 = vpop.permute.xlu0 %141  ;;  %456 = vperm.xlu1 %1014, %v358_v61  }
  0x7d   :  { %v67_v11 = vpop.permute.xlu2 %66 }
  0x7e   :  { %v132_v63 = vpop.permute.xlu1 %131 }
  0x82   :  { %803 = vperm.xlu0 %1013, %v800_v0  }
  0x84   :  { %v1279_v3 = vpop.permute.xlu0 %106 }
  0x86   :  { %v230_v4 = vpop.f32.mrf.mxu0  ;;  %v1281_v5 = vpop.permute.xlu1 %111 }
  0x87   :  { %v231_v13 = vadd.f32 %v230_v4, %v67_v11 }
  0x89   :  { %v270_v17 = vmul.f32 0.01, %v231_v13 }
  0x8b   :  { %v286_v23 = vmax.f32 %v231_v13, %v270_v17 }
  0x8c   :  { %v102_v7 = vpop.permute.xlu0 %101 }
  0x8e   :  { %v232_v8 = vpop.f32.mrf.mxu0  ;;  %v87_v9 = vpop.permute.xlu1 %86 }
  0x94   :  { %v77_v10 = vpop.permute.xlu0 %76 }
  0x96   :  { %v235_v12 = vpop.f32.mrf.mxu0  ;;  %v82_v16 = vpop.permute.xlu1 %81 }
  0x97   :  { %v236_v14 = vadd.f32 %v235_v12, %v77_v10 }
  0x99   :  { %v272_v20 = vmul.f32 0.01, %v236_v14 }
  0x9b   :  { %v288_v26 = vmax.f32 %v236_v14, %v272_v20  ;;  %v979_v20 = vld [vmem:[%s1444_s3] sm:$0xff] }
  0x9c   :  { %v72_v15 = vpop.permute.xlu0 %71 }
  0x9d   :  { %v233_v18 = vadd.f32 %v232_v8, %v72_v15 }
  0x9e   :  { %v237_v19 = vpop.f32.mrf.mxu0 }
  0x9f   :  { %v271_v21 = vmul.f32 0.01, %v233_v18  ;;  %v238_v22 = vadd.f32 %v237_v19, %v82_v16 }
  0xa1   :  { %v287_v24 = vmax.f32 %v233_v18, %v271_v21  ;;  %v273_v25 = vmul.f32 0.01, %v238_v22  ;;  %v986_v21 = vld [vmem:[%s1444_s3 + $0x38] sm:$0xff] }
  0xa3   :  { %v289_v27 = vmax.f32 %v238_v22, %v273_v25  ;;  %v1283_v28 = vpack.c.bf16 %v287_v24, %v286_v23  ;;  %v992_v22 = vld [vmem:[%s1444_s3 + $0x68] sm:$0xff]  ;;  %v987_v24 = vld [vmem:[%s1444_s3 + $0x40] sm:$0xff]  ;;  %v993_v25 = vld [vmem:[%s1444_s3 + $0x70] sm:$0xff] }
  0xa4   :  { %v980_v23 = vld [vmem:[%s1444_s3 + $0x8] sm:$0xff] }
  0xa5   :  { %v1285_v29 = vpack.c.bf16 %v289_v27, %v288_v26  ;;  %v981_v26 = vld [vmem:[%s1444_s3 + $0x10] sm:$0xff]  ;;  %v988_v27 = vld [vmem:[%s1444_s3 + $0x48] sm:$0xff] }
  0xa6   :  { %v240_v30 = vpop.f32.mrf.mxu0 }
  0xa7   :  { %v241_v31 = vadd.f32 %v240_v30, %v87_v9  ;;  %v1327_v30 = vpop.permute.xlu0 %526 }
  0xa9   :  { %v274_v33 = vmul.f32 0.01, %v241_v31 }
  0xab   :  { %v290_v36 = vmax.f32 %v241_v31, %v274_v33  ;;  %v982_v31 = vld [vmem:[%s1444_s3 + $0x18] sm:$0xff] }
  0xae   :  { %v242_v32 = vpop.f32.mrf.mxu0 }
  0xaf   :  { %v243_v34 = vadd.f32 %v242_v32, %v92_v6  ;;  %v989_v32 = vld [vmem:[%s1444_s3 + $0x50] sm:$0xff] }
  0xb1   :  { %v275_v35 = vmul.f32 0.01, %v243_v34 }
  0xb3   :  { %v291_v37 = vmax.f32 %v243_v34, %v275_v35  ;;  %v447_v34 = vpop.permute.xlu1 %446  ;;  %v1337_v35 = vpop.permute.xlu0 %441 }
  0xb5   :  { %v336_v38 = vpack.c.bf16 %v291_v37, %v290_v36  ;;  %v983_v37 = vld [vmem:[%s1444_s3 + $0x20] sm:$0xff] }
  0xb6   :  { %v245_v39 = vpop.f32.mrf.mxu0 }
  0xb7   :  { %v246_v40 = vadd.f32 %v245_v39, %v97_v2 }
  0xb9   :  { %v276_v42 = vmul.f32 0.01, %v246_v40 }
  0xbb   :  { %v292_v45 = vmax.f32 %v246_v40, %v276_v42  ;;  %v1347_v39 = vpop.permute.xlu1 %531  ;;  %v1349_v40 = vpop.permute.xlu0 %426 }
  0xbe   :  { %v247_v41 = vpop.f32.mrf.mxu0 }
  0xbf   :  { %v248_v43 = vadd.f32 %v247_v41, %v102_v7 }
  0xc1   :  { %v277_v44 = vmul.f32 0.01, %v248_v43 }
  0xc3   :  { %v293_v46 = vmax.f32 %v248_v43, %v277_v44  ;;  %v1353_v42 = vpop.permute.xlu1 %516  ;;  %v1355_v43 = vpop.permute.xlu0 %511  ;;  %v984_v44 = vld [vmem:[%s1444_s3 + $0x28] sm:$0xff] }
  0xc5   :  { %v337_v47 = vpack.c.bf16 %v293_v46, %v292_v45  ;;  %v991_v45 = vld [vmem:[%s1444_s3 + $0x60] sm:$0xff] }
  0xc6   :  { %v250_v48 = vpop.f32.mrf.mxu0 }
  0xc7   :  { %v251_v14 = vadd.f32 %v250_v48, %v1279_v3 }
  0xc9   :  { %v278_v17 = vmul.f32 0.01, %v251_v14 }
  0xcb   :  { %v294_v19 = vmax.f32 %v251_v14, %v278_v17  ;;  %v1367_v48 = vpop.permute.xlu0 %496 }
  0xce   :  { %v252_v49 = vpop.f32.mrf.mxu0 }
  0xcf   :  { %v253_v12 = vadd.f32 %v252_v49, %v1281_v5 }
  0xd6   :  { %v255_v50 = vpop.f32.mrf.mxu0 }
  0xd7   :  { %v256_v8 = vadd.f32 %v255_v50, %v1241_v51 }
  0xde   :  { %v257_v52 = vpop.f32.mrf.mxu0 }
  0xdf   :  { %v258_v4 = vadd.f32 %v257_v52, %v1265_v60  ;;  %v279_v60 = vmul.f32 0.01, %v253_v12  ;;  %v985_v52 = vld [vmem:[%s1444_s3 + $0x30] sm:$0xff] }
  0xe1   :  { %v281_v13 = vmul.f32 0.01, %v258_v4  ;;  %v295_v18 = vmax.f32 %v253_v12, %v279_v60 }
  0xe3   :  { %v338_v3 = vpack.c.bf16 %v295_v18, %v294_v19 }
  0xe6   :  { %v260_v53 = vpop.f32.mrf.mxu0 }
  0xe7   :  { %v261_v0 = vadd.f32 %v260_v53, %v1257_v57  ;;  %v280_v57 = vmul.f32 0.01, %v256_v8  ;;  %v1376_v53 = vpop.permute.xlu0 %411 }
  0xe9   :  { %v282_v9 = vmul.f32 0.01, %v261_v0  ;;  %v296_v51 = vmax.f32 %v256_v8, %v280_v57 }
  0xeb   :  { %v298_v15 = vmax.f32 %v261_v0, %v282_v9 }
  0xee   :  { %v262_v54 = vpop.f32.mrf.mxu0 }
  0xef   :  { %v263_v59 = vadd.f32 %v262_v54, %v132_v63 }
  0xf1   :  { %v283_v6 = vmul.f32 0.01, %v263_v59 }
  0xf6   :  { %v265_v56 = vpop.f32.mrf.mxu0 }
  0xf7   :  { %v266_v58 = vadd.f32 %v265_v56, %v1252_v55  ;;  %v299_v55 = vmax.f32 %v263_v59, %v283_v6 }
  0xf9   :  { %v284_v1 = vmul.f32 0.01, %v266_v58  ;;  %v340_v16 = vpack.c.bf16 %v299_v55, %v298_v15 }
  0xfb   :  { %v300_v10 = vmax.f32 %v266_v58, %v284_v1  ;;  %v397_v58 = vpop.permute.xlu0 %396 }
  0xfe   :  { %v267_v61 = vpop.f32.mrf.mxu0 }
  0xff   :  { %v268_v2 = vadd.f32 %v267_v61, %v1271_v62  ;;  %v297_v62 = vmax.f32 %v258_v4, %v281_v13 }
 0x101   :  { %v285_v7 = vmul.f32 0.01, %v268_v2  ;;  %v339_v5 = vpack.c.bf16 %v297_v62, %v296_v51 }
 0x103   :  { %v301_v11 = vmax.f32 %v268_v2, %v285_v7  ;;  %v1386_v0 = vpop.permute.xlu0 %481 }
 0x105   :  { %v341_v63 = vpack.c.bf16 %v301_v11, %v300_v10 }
 0x107   :  { %630 = vmatpush.bf16.msra.mxu1 %v341_v63  ;;  %995 = vmatpush.bf16.msra.mxu2 %v341_v63 }
 0x108   :  { %996 = vmatpush.bf16.msra.mxu3 %v341_v63 }
 0x10b   :  { %631 = vmatpush.bf16.msra.mxu1 %v340_v16  ;;  %997 = vmatpush.bf16.msra.mxu2 %v340_v16  ;;  %v1388_v4 = vpop.permute.xlu0 %466 }
 0x10c   :  { %998 = vmatpush.bf16.msra.mxu3 %v340_v16 }
 0x10f   :  { %632 = vmatpush.bf16.msra.mxu1 %v339_v5  ;;  %999 = vmatpush.bf16.msra.mxu2 %v339_v5 }
 0x110   :  { %1000 = vmatpush.bf16.msra.mxu3 %v339_v5 }
 0x113   :  { %633 = vmatpush.bf16.msra.mxu1 %v338_v3  ;;  %1001 = vmatpush.bf16.msra.mxu2 %v338_v3  ;;  %v382_v12 = vpop.permute.xlu0 %381 }
 0x114   :  { %1002 = vmatpush.bf16.msra.mxu3 %v338_v3 }
 0x117   :  { %634 = vmatpush.bf16.msra.mxu1 %v337_v47  ;;  %1003 = vmatpush.bf16.msra.mxu2 %v337_v47 }
 0x118   :  { %1004 = vmatpush.bf16.msra.mxu3 %v337_v47  ;;  %v1365_v47 = vpop.permute.xlu1 %431 }
 0x11b   :  { %635 = vmatpush.bf16.msra.mxu1 %v336_v38  ;;  %1005 = vmatpush.bf16.msra.mxu2 %v336_v38 }
 0x11c   :  { %1006 = vmatpush.bf16.msra.mxu3 %v336_v38  ;;  %v990_v38 = vld [vmem:[%s1444_s3 + $0x58] sm:$0xff] }
 0x11f   :  { %636 = vmatpush.bf16.msra.mxu1 %v1285_v29  ;;  %1007 = vmatpush.bf16.msra.mxu2 %v1285_v29 }
 0x120   :  { %1008 = vmatpush.bf16.msra.mxu3 %v1285_v29  ;;  %v452_v29 = vpop.permute.xlu2 %451  ;;  %v1371_v50 = vpop.permute.xlu1 %416 }
 0x123   :  { %637 = vmatpush.bf16.msra.mxu1 %v1283_v28  ;;  %1009 = vmatpush.bf16.msra.mxu2 %v1283_v28 }
 0x124   :  { %1010 = vmatpush.bf16.msra.mxu3 %v1283_v28  ;;  %v994_v28 = vld [vmem:[%s1444_s3 + $0x78] sm:$0xff] }
 0x126   :  { %638 = vmatmul.bf16.vlgmr.msra.gmra.mxu1 %v979_v20  ;;  %673 = vmatmul.bf16.vlgmr.msra.gmra.mxu2 %v986_v21 }
 0x127   :  { %703 = vmatmul.bf16.vlgmr.msra.gmra.mxu3 %v992_v22 }
 0x128   :  { %v1335_v33 = vpop.permute.xlu2 %436  ;;  %v1380_v56 = vpop.permute.xlu1 %501 }
 0x130   :  { %v1339_v36 = vpop.permute.xlu2 %521  ;;  %v1384_v61 = vpop.permute.xlu1 %486 }
 0x136   :  { %643 = vmatmul.bf16.gmra.mxu1 %v980_v23  ;;  %678 = vmatmul.bf16.gmra.mxu2 %v987_v24 }
 0x137   :  { %708 = vmatmul.bf16.gmra.mxu3 %v993_v25 }
 0x138   :  { %v1351_v41 = vpop.permute.xlu2 %506  ;;  %v402_v2 = vpop.permute.xlu1 %401 }
 0x140   :  { %v1363_v46 = vpop.permute.xlu2 %421  ;;  %v387_v9 = vpop.permute.xlu1 %386 }
 0x146   :  { %648 = vmatmul.bf16.gmra.mxu1 %v981_v26  ;;  %683 = vmatmul.bf16.gmra.mxu2 %v988_v27 }
 0x147   :  { %713 = vmatmul.bf16.gmra.mxu3 %v994_v28 }
 0x148   :  { %v1369_v49 = vpop.permute.xlu2 %406  ;;  %v1394_v5 = vpop.permute.xlu1 %471 }
 0x150   :  { %v1378_v54 = vpop.permute.xlu2 %491 }
 0x156   :  { %653 = vmatmul.bf16.gmra.mxu1 %v982_v31  ;;  %688 = vmatmul.bf16.gmra.mxu2 %v989_v32  ;;  %v457_v31 = vpop.permute.xlu1 %456 }
 0x158   :  { %v1382_v59 = vpop.permute.xlu2 %476 }
 0x160   :  { %v392_v1 = vpop.permute.xlu2 %391 }
 0x166   :  { %658 = vmatmul.bf16.gmra.mxu1 %v983_v37  ;;  %693 = vmatmul.bf16.gmra.mxu2 %v990_v38 }
 0x168   :  { %v377_v7 = vpop.permute.xlu2 %376 }
 0x170   :  { %v462_v38 = vpop.permute.xlu2 %461 }
 0x176   :  { %663 = vmatmul.bf16.gmra.mxu1 %v984_v44  ;;  %698 = vmatmul.bf16.gmra.mxu2 %v991_v45 }
 0x186   :  { %668 = vmatmul.bf16.gmra.mxu1 %v985_v52 }
 0x1a3   :  { %v639_v6 = vpop.f32.mrf.mxu1 }
 0x1a4   :  { %v640_v8 = vadd.f32 %v639_v6, %v377_v7 }
 0x1a6   :  { %v719_v55 = vmul.f32 0.01, %v640_v8 }
 0x1a8   :  { %v751_v15 = vmax.f32 %v640_v8, %v719_v55 }
 0x1a9   :  { %v674_v10 = vpop.f32.mrf.mxu2 }
 0x1aa   :  { %v1390_v11 = vpop.f32.mrf.mxu3  ;;  %v675_v14 = vadd.f32 %v674_v10, %v447_v34 }
 0x1ab   :  { %v641_v13 = vpop.f32.mrf.mxu1 }
 0x1ac   :  { %v642_v63 = vadd.f32 %v641_v13, %v382_v12  ;;  %v733_v16 = vmul.f32 0.01, %v675_v14 }
 0x1ae   :  { %v720_v57 = vmul.f32 0.01, %v642_v63  ;;  %v765_v20 = vmax.f32 %v675_v14, %v733_v16 }
 0x1b0   :  { %v752_v60 = vmax.f32 %v642_v63, %v720_v57 }
 0x1b1   :  { %v676_v62 = vpop.f32.mrf.mxu2 }
 0x1b2   :  { %v677_v17 = vadd.f32 %v676_v62, %v452_v29  ;;  %v706_v51 = vpop.f32.mrf.mxu3  ;;  %v1392_v18 = vpack.c.bf16 %v752_v60, %v751_v15 }
 0x1b3   :  { %v644_v19 = vpop.f32.mrf.mxu1 }
 0x1b4   :  { %v734_v3 = vmul.f32 0.01, %v677_v17  ;;  %v645_v22 = vadd.f32 %v644_v19, %v387_v9 }
 0x1b6   :  { %v766_v21 = vmax.f32 %v677_v17, %v734_v3  ;;  %v721_v27 = vmul.f32 0.01, %v645_v22 }
 0x1b8   :  { %v791_v23 = vpack.c.bf16 %v766_v21, %v765_v20  ;;  %v753_v34 = vmax.f32 %v645_v22, %v721_v27 }
 0x1b9   :  { %v679_v24 = vpop.f32.mrf.mxu2 }
 0x1ba   :  { %v709_v25 = vpop.f32.mrf.mxu3  ;;  %812 = vmatpush.bf16.msrb.mxu2 %v791_v23  ;;  %v680_v32 = vadd.f32 %v679_v24, %v457_v31 }
 0x1bb   :  { %v646_v26 = vpop.f32.mrf.mxu1 }
 0x1bc   :  { %v647_v28 = vadd.f32 %v646_v26, %v392_v1  ;;  %v735_v45 = vmul.f32 0.01, %v680_v32 }
 0x1be   :  { %v722_v29 = vmul.f32 0.01, %v647_v28  ;;  %v767_v10 = vmax.f32 %v680_v32, %v735_v45 }
 0x1c0   :  { %v754_v37 = vmax.f32 %v647_v28, %v722_v29 }
 0x1c1   :  { %v681_v44 = vpop.f32.mrf.mxu2 }
 0x1c2   :  { %v682_v52 = vadd.f32 %v681_v44, %v462_v38  ;;  %v711_v6 = vpop.f32.mrf.mxu3  ;;  %v1396_v7 = vpack.c.bf16 %v754_v37, %v753_v34 }
 0x1c3   :  { %v649_v8 = vpop.f32.mrf.mxu1  ;;  %v712_v19 = vadd.f32 %v711_v6, %v1339_v36 }
 0x1c4   :  { %v736_v9 = vmul.f32 0.01, %v682_v52  ;;  %v650_v13 = vadd.f32 %v649_v8, %v397_v58  ;;  %v710_v58 = vadd.f32 %v709_v25, %v1353_v42 }
 0x1c5   :  { %v748_v26 = vmul.f32 0.01, %v712_v19 }
 0x1c6   :  { %v768_v12 = vmax.f32 %v682_v52, %v736_v9  ;;  %v723_v57 = vmul.f32 0.01, %v650_v13  ;;  %v747_v28 = vmul.f32 0.01, %v710_v58 }
 0x1c7   :  { %v780_v29 = vmax.f32 %v712_v19, %v748_v26 }
 0x1c8   :  { %v1398_v55 = vpack.c.bf16 %v768_v12, %v767_v10  ;;  %v755_v16 = vmax.f32 %v650_v13, %v723_v57  ;;  %v779_v25 = vmax.f32 %v710_v58, %v747_v28 }
 0x1c9   :  { %v1400_v1 = vpop.f32.mrf.mxu2 }
 0x1ca   :  { %v714_v63 = vpop.f32.mrf.mxu3  ;;  %v798_v44 = vpack.c.bf16 %v780_v29, %v779_v25 }
 0x1cb   :  { %v651_v14 = vpop.f32.mrf.mxu1  ;;  %v715_v62 = vadd.f32 %v714_v63, %v1327_v30  ;;  %v705_v30 = vadd.f32 %v1390_v11, %v1351_v41 }
 0x1cc   :  { %v652_v15 = vadd.f32 %v651_v14, %v402_v2  ;;  %v707_v2 = vadd.f32 %v706_v51, %v1355_v43  ;;  %v783_v14 = vld [vmem:[%s1446_s5] sm:$0x3]  ;;  %s1043_s5 = smov [#allocation2]  }
 0x1cd   :  { %v749_v22 = vmul.f32 0.01, %v715_v62  ;;  %v745_v42 = vmul.f32 0.01, %v705_v30  ;;  %807 = vst [vmem:[#allocation1] ss:$9 sm:$0xff] %v783_v14 }
 0x1ce   :  { %v724_v60 = vmul.f32 0.01, %v652_v15  ;;  %v746_v32 = vmul.f32 0.01, %v707_v2  ;;  %s846_s21 = sshll.u32 %s1043_s5, 4  ;;  %s847_s21 = int_to_ptr.vmem [resolvable:$true] %s846_s21 }
 0x1cf   :  { %v781_v36 = vmax.f32 %v715_v62, %v749_v22  ;;  %v777_v45 = vmax.f32 %v705_v30, %v745_v42 }
 0x1d0   :  { %v756_v17 = vmax.f32 %v652_v15, %v724_v60  ;;  %v778_v38 = vmax.f32 %v707_v2, %v746_v32 }
 0x1d1   :  { %v686_v3 = vpop.f32.mrf.mxu2 }
 0x1d2   :  { %v716_v20 = vpop.f32.mrf.mxu3  ;;  %v1404_v21 = vpack.c.bf16 %v756_v17, %v755_v16  ;;  %v797_v51 = vpack.c.bf16 %v778_v38, %v777_v45  ;;  %v687_v22 = vadd.f32 %v686_v3, %v1394_v5 }
 0x1d3   :  { %v717_v23 = vadd.f32 %v716_v20, %v1347_v39  ;;  %v1408_v24 = vpop.f32.mrf.mxu1 }
 0x1d4   :  { %v738_v28 = vmul.f32 0.01, %v687_v22 }
 0x1d5   :  { %v750_v27 = vmul.f32 0.01, %v717_v23 }
 0x1d7   :  { %v782_v31 = vmax.f32 %v717_v23, %v750_v27 }
 0x1d9   :  { %v689_v34 = vpop.f32.mrf.mxu2  ;;  %v799_v37 = vpack.c.bf16 %v782_v31, %v781_v36 }
 0x1db   :  { %825 = vmatpush.bf16.msrb.mxu3 %v799_v37  ;;  %v656_v39 = vpop.f32.mrf.mxu1 }
 0x1df   :  { %826 = vmatpush.bf16.msrb.mxu3 %v798_v44 }
 0x1e1   :  { %v691_v43 = vpop.f32.mrf.mxu2 }
 0x1e2   :  { %v692_v62 = vadd.f32 %v691_v43, %v1386_v0 }
 0x1e3   :  { %827 = vmatpush.bf16.msrb.mxu3 %v797_v51  ;;  %v659_v52 = vpop.f32.mrf.mxu1 }
 0x1e4   :  { %v740_v23 = vmul.f32 0.01, %v692_v62 }
 0x1e9   :  { %v694_v41 = vpop.f32.mrf.mxu2 }
 0x1ea   :  { %v695_v57 = vadd.f32 %v694_v41, %v1384_v61 }
 0x1eb   :  { %v661_v11 = vpop.f32.mrf.mxu1 }
 0x1ec   :  { %v741_v20 = vmul.f32 0.01, %v695_v57 }
 0x1ee   :  { %v773_v0 = vmax.f32 %v695_v57, %v741_v20  ;;  %v804_v57 = vpop.permute.xlu0 %803 }
 0x1f1   :  { %v696_v6 = vpop.f32.mrf.mxu2 }
 0x1f2   :  { %v697_v13 = vadd.f32 %v696_v6, %v1378_v54 }
 0x1f3   :  { %v664_v8 = vpop.f32.mrf.mxu1 }
 0x1f4   :  { %v742_v17 = vmul.f32 0.01, %v697_v13  ;;  %v665_v31 = vadd.f32 %v664_v8, %v1349_v40  ;;  %v657_v40 = vadd.f32 %v656_v39, %v1376_v53  ;;  %v809_v39 = vld [vmem:[#allocation1 + $0x9] sm:$0xff] }
 0x1f6   :  { %v774_v2 = vmax.f32 %v697_v13, %v742_v17  ;;  %v729_v42 = vmul.f32 0.01, %v665_v31  ;;  %v726_v8 = vmul.f32 0.01, %v657_v40 }
 0x1f8   :  { %v795_v3 = vpack.c.bf16 %v774_v2, %v773_v0 }
 0x1f9   :  { %v699_v9 = vpop.f32.mrf.mxu2 }
 0x1fa   :  { %v700_v12 = vadd.f32 %v699_v9, %v1367_v48  ;;  %v690_v48 = vadd.f32 %v689_v34, %v1382_v59  ;;  %v772_v59 = vmax.f32 %v692_v62, %v740_v23  ;;  %v662_v34 = vadd.f32 %v661_v11, %v1363_v46 }
 0x1fb   :  { %v666_v10 = vpop.f32.mrf.mxu1  ;;  %v655_v46 = vadd.f32 %v1408_v24, %v1369_v49  ;;  %v761_v11 = vmax.f32 %v665_v31, %v729_v42  ;;  %v808_v24 = vld [vmem:[#allocation1] sm:$0xff] }
 0x1fc   :  { %v743_v15 = vmul.f32 0.01, %v700_v12  ;;  %v739_v27 = vmul.f32 0.01, %v690_v48  ;;  %v667_v30 = vadd.f32 %v666_v10, %v1365_v47  ;;  %v660_v47 = vadd.f32 %v659_v52, %v1371_v50 }
 0x1fd   :  { %v728_v43 = vmul.f32 0.01, %v662_v34  ;;  %v725_v9 = vmul.f32 0.01, %v655_v46 }
 0x1fe   :  { %v775_v54 = vmax.f32 %v700_v12, %v743_v15  ;;  %v730_v37 = vmul.f32 0.01, %v667_v30  ;;  %v727_v41 = vmul.f32 0.01, %v660_v47  ;;  %v758_v12 = vmax.f32 %v657_v40, %v726_v8 }
 0x1ff   :  { %v760_v50 = vmax.f32 %v662_v34, %v728_v43  ;;  %v757_v13 = vmax.f32 %v655_v46, %v725_v9 }
 0x200   :  { %v759_v10 = vmax.f32 %v660_v47, %v727_v41 }
 0x201   :  { %v701_v63 = vpop.f32.mrf.mxu2  ;;  %v787_v49 = vpack.c.bf16 %v758_v12, %v757_v13 }
 0x202   :  { %v702_v60 = vadd.f32 %v701_v63, %v1380_v56  ;;  %v685_v56 = vadd.f32 %v1400_v1, %v1388_v4  ;;  %v770_v1 = vmax.f32 %v687_v22, %v738_v28  ;;  %v788_v53 = vpack.c.bf16 %v760_v50, %v759_v10 }
 0x203   :  { %v669_v16 = vpop.f32.mrf.mxu1 }
 0x204   :  { %v744_v19 = vmul.f32 0.01, %v702_v60  ;;  %v670_v61 = vadd.f32 %v669_v16, %v1335_v33  ;;  %v737_v29 = vmul.f32 0.01, %v685_v56  ;;  %v771_v33 = vmax.f32 %v690_v48, %v739_v27 }
 0x206   :  { %v776_v58 = vmax.f32 %v702_v60, %v744_v19  ;;  %v731_v32 = vmul.f32 0.01, %v670_v61  ;;  %v794_v44 = vpack.c.bf16 %v772_v59, %v771_v33  ;;  %v769_v45 = vmax.f32 %v685_v56, %v737_v29 }
 0x208   :  { %v796_v26 = vpack.c.bf16 %v776_v58, %v775_v54  ;;  %v763_v25 = vmax.f32 %v670_v61, %v731_v32  ;;  %v793_v6 = vpack.c.bf16 %v770_v1, %v769_v45 }
 0x20a   :  { %828 = vmatpush.bf16.msrb.mxu3 %v796_v26 }
 0x20b   :  { %v671_v36 = vpop.f32.mrf.mxu1 }
 0x20c   :  { %v672_v5 = vadd.f32 %v671_v36, %v1337_v35  ;;  %v762_v35 = vmax.f32 %v667_v30, %v730_v37 }
 0x20e   :  { %v732_v4 = vmul.f32 0.01, %v672_v5  ;;  %829 = vmatpush.bf16.msrb.mxu3 %v795_v3  ;;  %v789_v52 = vpack.c.bf16 %v762_v35, %v761_v11 }
 0x210   :  { %v764_v38 = vmax.f32 %v672_v5, %v732_v4 }
 0x212   :  { %830 = vmatpush.bf16.msrb.mxu3 %v794_v44  ;;  %v790_v51 = vpack.c.bf16 %v764_v38, %v763_v25 }
 0x214   :  { %813 = vmatpush.bf16.msrb.mxu2 %v790_v51 }
 0x216   :  { %831 = vmatpush.bf16.msrb.mxu3 %v793_v6 }
 0x218   :  { %814 = vmatpush.bf16.msrb.mxu2 %v789_v52 }
 0x21a   :  { %832 = vmatpush.bf16.msrb.mxu3 %v1398_v55 }
 0x21c   :  { %815 = vmatpush.bf16.msrb.mxu2 %v788_v53 }
 0x21d   :  { %833 = vmatmul.bf16.vlgmr.msrb.gmra.mxu3 %v809_v39 }
 0x220   :  { %816 = vmatpush.bf16.msrb.mxu2 %v787_v49 }
 0x224   :  { %817 = vmatpush.bf16.msrb.mxu2 %v1404_v21 }
 0x228   :  { %818 = vmatpush.bf16.msrb.mxu2 %v1396_v7 }
 0x22c   :  { %819 = vmatpush.bf16.msrb.mxu2 %v1392_v18 }
 0x22f   :  { %820 = vmatmul.bf16.vlgmr.msrb.gmra.mxu2 %v808_v24 }
 0x2a0   :  { %v834_v63 = vpop.f32.mrf.mxu3 }
 0x2a8   :  { %v836_v14 = vpop.f32.mrf.mxu3 }
 0x2b2   :  { %v821_v15 = vpop.f32.mrf.mxu2 }
 0x2b3   :  { %v822_v55 = vadd.f32 %v821_v15, %v804_v57 }
 0x2b5   :  { %v835_v60 = vadd.f32 %v834_v63, %v822_v55 }
 0x2b7   :  { %v838_v62 = vmul.f32 0.01, %v835_v60 }
 0x2b9   :  { %v839_v21 = vmax.f32 %v835_v60, %v838_v62 }
 0x2ba   :  { %v823_v7 = vpop.f32.mrf.mxu2 }
 0x2bb   :  { %840 = vst [vmem:[#allocation2] sm:$0x3] %v839_v21 }
 0x2bc   :  { %851 = dma.vmem_to_hbm [thread:$0]  %s847_s21, 32, %s849_s24, [#allocation3]  }
 0x2bd   :  { %1040 = dma.done.wait [#allocation3], 32  }
 0x2be   :  { %1041 = vsyncadd [#allocation3], 4294967264 }
 0x2bf   :  { %856 = vsyncpa [#allocation3], 1 }

</bundles_post_ra>
